<compile_context>
chip_gen: v7x
topology: tpu7x:2x2x1
jax: 0.10.0
libtpu: 0.0.40
codegen_flags: <defaults>
</compile_context>

<pallas_src>
import functools

import jax
import jax.numpy as jnp
from jax.experimental import pallas as pl
from jax.experimental.pallas import tpu as pltpu


def _amsoftmax_kernel(x_ref, w_ref, label_ref, out_ref, *, margin, scale, mxu_dtype):
    x = x_ref[...]            # (B, D) f32
    w = w_ref[...]            # (D, C) f32
    lab = label_ref[...]      # (B, 1) i32

    B, _ = x.shape
    C = w.shape[1]

    # Raw matmul on the MXU (operands cast only at the MXU boundary; f32 accumulate).
    raw = jnp.dot(x.astype(mxu_dtype), w.astype(mxu_dtype),
                  preferred_element_type=jnp.float32)              # (B, C)

    # Fused rsqrt-and-multiply normalization applied AFTER the matmul (O(B*C) work).
    # rsqrt(max(sumsq, 1e-24)) == 1 / clamp(norm, 1e-12) within float tolerance.
    inv_xn = jax.lax.rsqrt(jnp.maximum(jnp.sum(x * x, axis=1, keepdims=True), 1e-24))  # (B, 1)
    inv_wn = jax.lax.rsqrt(jnp.maximum(jnp.sum(w * w, axis=0, keepdims=True), 1e-24))  # (1, C)
    costh = raw * inv_xn * inv_wn                                  # (B, C)

    # Subtract the margin at the label column, then scale.
    class_ids = jax.lax.broadcasted_iota(jnp.int32, (B, C), 1)
    onehot = class_ids == lab                                      # (B, C) bool
    logits = scale * jnp.where(onehot, costh - margin, costh)      # (B, C)

    # Cross-entropy (mean reduction), numerically stable.
    row_max = jnp.max(logits, axis=1, keepdims=True)               # (B, 1)
    lse = jnp.log(jnp.sum(jnp.exp(logits - row_max), axis=1, keepdims=True)) + row_max
    tgt = jnp.sum(jnp.where(onehot, logits, 0.0), axis=1, keepdims=True)  # (B, 1)
    per_example = lse - tgt                                         # (B, 1)
    loss = jnp.sum(per_example, axis=0, keepdims=True) * (1.0 / B)  # (1, 1)

    # Top-1 accuracy (percent).  First-occurrence argmax (matches torch.max/topk on
    # ties), reusing row_max / class_ids.
    pred = jnp.min(jnp.where(logits == row_max, class_ids, C), axis=1, keepdims=True)
    correct = (pred == lab).astype(jnp.float32)                     # (B, 1)
    prec = jnp.sum(correct, axis=0, keepdims=True) * (100.0 / B)    # (1, 1)

    # Single lane-dense output: lane 0 = loss, lane 1 = prec1, rest zero.
    lane = jax.lax.broadcasted_iota(jnp.int32, (1, 128), 1)
    out_ref[...] = jnp.where(lane == 0, loss, jnp.where(lane == 1, prec, 0.0))


def amsoftmax_loss(x, W, label, *, margin=0.3, scale=15.0, mxu_dtype=jnp.float32):
    """Returns (loss, prec1) exactly like LossFunction.forward.

    Set mxu_dtype=jnp.bfloat16 on v6e/v7x for large D/C (elementwise math stays f32).
    """
    B, D = x.shape
    D2, C = W.shape
    assert D == D2 and label.shape[0] == B
    label_2d = label.astype(jnp.int32).reshape(B, 1)

    kernel = functools.partial(
        _amsoftmax_kernel, margin=float(margin), scale=float(scale), mxu_dtype=mxu_dtype
    )

    out = pl.pallas_call(
        kernel,
        out_shape=jax.ShapeDtypeStruct((1, 128), jnp.float32),
        in_specs=[
            pl.BlockSpec(memory_space=pltpu.MemorySpace.VMEM),
            pl.BlockSpec(memory_space=pltpu.MemorySpace.VMEM),
            pl.BlockSpec(memory_space=pltpu.MemorySpace.VMEM),
        ],
        out_specs=pl.BlockSpec(memory_space=pltpu.MemorySpace.VMEM),
    )(x.astype(jnp.float32), W.astype(jnp.float32), label_2d)
    return out[0, 0], out[0, 1]


if __name__ == "__main__":
    B, nOut, nClasses = 8, 32, 26
    margin, scale = 0.3, 15.0

    key = jax.random.PRNGKey(0)
    kx, kw, kl = jax.random.split(key, 3)

    # Deterministic inputs.
    x = jax.random.normal(kx, (B, nOut), dtype=jnp.float32)
    label = jax.random.randint(kl, (B,), 0, nClasses, dtype=jnp.int32)

    # W ~ xavier_normal_(gain=1): std = sqrt(2 / (fan_in + fan_out))
    xavier_std = (2.0 / (nOut + nClasses)) ** 0.5
    W = xavier_std * jax.random.normal(kw, (nOut, nClasses), dtype=jnp.float32)

    # --- f32 MXU path (strict check against the pure-JAX reference) ---
    loss, prec1 = amsoftmax_loss(x, W, label, margin=margin, scale=scale)
    jax.block_until_ready((loss, prec1))

    xn = x / jnp.maximum(jnp.linalg.norm(x, axis=1, keepdims=True), 1e-12)
    wn = W / jnp.maximum(jnp.linalg.norm(W, axis=0, keepdims=True), 1e-12)
    logits = scale * (xn @ wn - margin * jax.nn.one_hot(label, nClasses))
    ref_loss = jnp.mean(
        jax.nn.logsumexp(logits, axis=1) - jnp.take_along_axis(logits, label[:, None], 1)[:, 0]
    )
    ref_prec = 100.0 * jnp.mean((jnp.argmax(logits, axis=1) == label).astype(jnp.float32))
    assert jnp.allclose(loss, ref_loss, atol=1e-4, rtol=1e-4), (loss, ref_loss)
    assert jnp.allclose(prec1, ref_prec, atol=1e-4), (prec1, ref_prec)

    # --- bf16 MXU path (v6e/v7x recommendation) — loose check, same semantics ---
    loss_bf, prec_bf = amsoftmax_loss(
        x, W, label, margin=margin, scale=scale, mxu_dtype=jnp.bfloat16
    )
    jax.block_until_ready((loss_bf, prec_bf))
    assert jnp.allclose(loss_bf, ref_loss, atol=0.25, rtol=0.1), (loss_bf, ref_loss)

    print("KERNEL_OK")
</pallas_src>

<mosaic_0001>
module attributes {stable_mosaic.version = 11 : i64} {
  func.func @_amsoftmax_kernel(%arg0: memref<8x32xf32, #tpu.memory_space<vmem>>, %arg1: memref<32x26xf32, #tpu.memory_space<vmem>>, %arg2: memref<8x1xi32, #tpu.memory_space<vmem>>, %arg3: memref<1x128xf32, #tpu.memory_space<vmem>>) attributes {dimension_semantics = [], scalar_prefetch = 0 : i64, scratch_operands = 0 : i64, tpu.core_type = #tpu.core_type<tc>} {
    %c0 = arith.constant 0 : index
    %c0_0 = arith.constant 0 : index
    %0 = vector.load %arg0[%c0, %c0_0] : memref<8x32xf32, #tpu.memory_space<vmem>>, vector<8x32xf32>
    %c0_1 = arith.constant 0 : index
    %c0_2 = arith.constant 0 : index
    %1 = vector.load %arg1[%c0_1, %c0_2] : memref<32x26xf32, #tpu.memory_space<vmem>>, vector<32x26xf32>
    %c0_3 = arith.constant 0 : index
    %c0_4 = arith.constant 0 : index
    %2 = vector.load %arg2[%c0_3, %c0_4] : memref<8x1xi32, #tpu.memory_space<vmem>>, vector<8x1xi32>
    %cst = arith.constant dense<0.000000e+00> : vector<8x26xf32>
    %3 = tpu.matmul %0, %1, %cst {dimension_numbers = #tpu.dot_dimension_numbers<[1], [0], [0], [1], [0, 0, 1, 1], [], []>} : vector<8x32xf32>, vector<32x26xf32>, vector<8x26xf32> -> vector<8x26xf32>
    %4 = arith.mulf %0, %0 : vector<8x32xf32>
    %cst_5 = arith.constant dense<0.000000e+00> : vector<8xf32>
    %5 = vector.multi_reduction <add>, %4, %cst_5 [1] : vector<8x32xf32> to vector<8xf32>
    %6 = vector.shape_cast %5 : vector<8xf32> to vector<8x1xf32>
    %cst_6 = arith.constant 1.000000e-24 : f32
    %7 = vector.broadcast %cst_6 : f32 to vector<8x1xf32>
    %8 = arith.maximumf %6, %7 : vector<8x1xf32>
    %9 = math.rsqrt %8 : vector<8x1xf32>
    %10 = arith.mulf %1, %1 : vector<32x26xf32>
    %cst_7 = arith.constant dense<0.000000e+00> : vector<26xf32>
    %11 = vector.multi_reduction <add>, %10, %cst_7 [0] : vector<32x26xf32> to vector<26xf32>
    %12 = vector.shape_cast %11 : vector<26xf32> to vector<1x26xf32>
    %cst_8 = arith.constant 1.000000e-24 : f32
    %13 = vector.broadcast %cst_8 : f32 to vector<1x26xf32>
    %14 = arith.maximumf %12, %13 : vector<1x26xf32>
    %15 = math.rsqrt %14 : vector<1x26xf32>
    %16 = vector.broadcast %9 : vector<8x1xf32> to vector<8x26xf32>
    %17 = arith.mulf %3, %16 : vector<8x26xf32>
    %18 = vector.broadcast %15 : vector<1x26xf32> to vector<8x26xf32>
    %19 = arith.mulf %17, %18 : vector<8x26xf32>
    %20 = tpu.iota {dimensions = array<i32: 1>} : vector<8x26xi32>
    %21 = vector.broadcast %2 : vector<8x1xi32> to vector<8x26xi32>
    %22 = arith.cmpi eq, %20, %21 : vector<8x26xi32>
    %cst_9 = arith.constant 3.000000e-01 : f32
    %23 = vector.broadcast %cst_9 : f32 to vector<8x26xf32>
    %24 = arith.subf %19, %23 : vector<8x26xf32>
    %25 = arith.select %22, %24, %19 : vector<8x26xi1>, vector<8x26xf32>
    %cst_10 = arith.constant 1.500000e+01 : f32
    %26 = vector.broadcast %cst_10 : f32 to vector<8x26xf32>
    %27 = arith.mulf %26, %25 : vector<8x26xf32>
    %cst_11 = arith.constant dense<0xFF800000> : vector<8xf32>
    %28 = vector.multi_reduction <maximumf>, %27, %cst_11 [1] : vector<8x26xf32> to vector<8xf32>
    %29 = vector.shape_cast %28 : vector<8xf32> to vector<8x1xf32>
    %30 = vector.broadcast %29 : vector<8x1xf32> to vector<8x26xf32>
    %31 = arith.subf %27, %30 : vector<8x26xf32>
    %32 = math.exp %31 : vector<8x26xf32>
    %cst_12 = arith.constant dense<0.000000e+00> : vector<8xf32>
    %33 = vector.multi_reduction <add>, %32, %cst_12 [1] : vector<8x26xf32> to vector<8xf32>
    %34 = vector.shape_cast %33 : vector<8xf32> to vector<8x1xf32>
    %35 = math.log %34 : vector<8x1xf32>
    %36 = arith.addf %35, %29 : vector<8x1xf32>
    %cst_13 = arith.constant 0.000000e+00 : f32
    %37 = vector.broadcast %cst_13 : f32 to vector<8x26xf32>
    %38 = arith.select %22, %27, %37 : vector<8x26xi1>, vector<8x26xf32>
    %cst_14 = arith.constant dense<0.000000e+00> : vector<8xf32>
    %39 = vector.multi_reduction <add>, %38, %cst_14 [1] : vector<8x26xf32> to vector<8xf32>
    %40 = vector.shape_cast %39 : vector<8xf32> to vector<8x1xf32>
    %41 = arith.subf %36, %40 : vector<8x1xf32>
    %cst_15 = arith.constant dense<0.000000e+00> : vector<1xf32>
    %42 = vector.multi_reduction <add>, %41, %cst_15 [0] : vector<8x1xf32> to vector<1xf32>
    %43 = vector.shape_cast %42 : vector<1xf32> to vector<1x1xf32>
    %cst_16 = arith.constant 1.250000e-01 : f32
    %44 = vector.broadcast %cst_16 : f32 to vector<1x1xf32>
    %45 = arith.mulf %43, %44 : vector<1x1xf32>
    %46 = vector.broadcast %29 : vector<8x1xf32> to vector<8x26xf32>
    %47 = arith.cmpf oeq, %27, %46 : vector<8x26xf32>
    %c26_i32 = arith.constant 26 : i32
    %48 = vector.broadcast %c26_i32 : i32 to vector<8x26xi32>
    %49 = arith.select %47, %20, %48 : vector<8x26xi1>, vector<8x26xi32>
    %cst_17 = arith.constant dense<2147483647> : vector<8xi32>
    %50 = vector.multi_reduction <minsi>, %49, %cst_17 [1] : vector<8x26xi32> to vector<8xi32>
    %51 = vector.shape_cast %50 : vector<8xi32> to vector<8x1xi32>
    %52 = arith.cmpi eq, %51, %2 : vector<8x1xi32>
    %53 = arith.extui %52 : vector<8x1xi1> to vector<8x1xi32>
    %54 = arith.sitofp %53 : vector<8x1xi32> to vector<8x1xf32>
    %cst_18 = arith.constant dense<0.000000e+00> : vector<1xf32>
    %55 = vector.multi_reduction <add>, %54, %cst_18 [0] : vector<8x1xf32> to vector<1xf32>
    %56 = vector.shape_cast %55 : vector<1xf32> to vector<1x1xf32>
    %cst_19 = arith.constant 1.250000e+01 : f32
    %57 = vector.broadcast %cst_19 : f32 to vector<1x1xf32>
    %58 = arith.mulf %56, %57 : vector<1x1xf32>
    %59 = tpu.iota {dimensions = array<i32: 1>} : vector<1x128xi32>
    %c0_i32 = arith.constant 0 : i32
    %60 = vector.broadcast %c0_i32 : i32 to vector<1x128xi32>
    %61 = arith.cmpi eq, %59, %60 : vector<1x128xi32>
    %c1_i32 = arith.constant 1 : i32
    %62 = vector.broadcast %c1_i32 : i32 to vector<1x128xi32>
    %63 = arith.cmpi eq, %59, %62 : vector<1x128xi32>
    %cst_20 = arith.constant 0.000000e+00 : f32
    %64 = vector.shape_cast %58 : vector<1x1xf32> to vector<1x1xf32>
    %65 = vector.broadcast %64 : vector<1x1xf32> to vector<1x128xf32>
    %66 = vector.broadcast %cst_20 : f32 to vector<1x128xf32>
    %67 = arith.select %63, %65, %66 : vector<1x128xi1>, vector<1x128xf32>
    %68 = vector.shape_cast %45 : vector<1x1xf32> to vector<1x1xf32>
    %69 = vector.broadcast %68 : vector<1x1xf32> to vector<1x128xf32>
    %70 = arith.select %61, %69, %67 : vector<1x128xi1>, vector<1x128xf32>
    %c0_21 = arith.constant 0 : index
    %c0_22 = arith.constant 0 : index
    %71 = vector.load %arg3[%c0_21, %c0_22] : memref<1x128xf32, #tpu.memory_space<vmem>>, vector<1x128xf32>
    tpu.vector_store %arg3[%c0_21, %c0_22], %70 {strides = array<i32>} : memref<1x128xf32, #tpu.memory_space<vmem>>, vector<1x128xf32>,
    return
  }
}

</mosaic_0001>

<bundles_post_ra>
// kernel: tpu_custom_call.1
= control target key start
LH: loop header
LB: loop body
LE: loop exit
PB: predicated region body
PF: predicated region fallthrough
CT: control target
= control target key end

     0   :  { %8 = vsyncpa [#allocation3], 0  ;;  %s393_s0 = inlined_call_operand.vmem [shape: f32[8,32], index: 0, kind: input, shape index: {}]   ;;  %s394_s1 = inlined_call_operand.hbm [shape: f32[32,26], index: 1, kind: input, shape index: {}]   ;;  %s395_s2 = inlined_call_operand.vmem [shape: s32[8,1], index: 2, kind: input, shape index: {}]   ;;  %s396_s3 = inlined_call_operand.hbm [shape: f32[1,128], index: 3, kind: output, shape index: {}]  }
   0x1   :  { %9 = vsyncpa [#allocation4], 0  ;;  %s315_s12 = smov [#allocation2]   ;;  %s267_s16 = scalar_lea.hbm %s394_s1, 512 }
   0x2   :  { %s17_s13 = sshll.u32 %s315_s12, 4  ;;  %p268_p0 = scmp.ne.s32.totalorder %s394_s1, %s267_s16  ;;  %s18_s13 = int_to_ptr.vmem [resolvable:$true] %s17_s13 }
   0x3   :  { %p271_p1 = scmp.lt.u32.totalorder %s267_s16, %s394_s1 }
   0x5   :  { %p273_p2 = pnand %p271_p1, %p268_p0 }
   0x7   :  { %276 = shalt.err (!%p273_p2)
}
   0x8   :  { %s277_s21 = scalar_lea.vmem %s18_s13, 512  ;;  %p282_p4 = scmp.lt.s32.totalorder %s18_s13, %s18_s13 }
   0x9   :  { %p278_p3 = scmp.ne.s32.totalorder %s18_s13, %s277_s21  ;;  %p283_p5 = scmp.lt.s32.totalorder %s277_s21, %s277_s21 }
   0xb   :  { %p284_p6 = por %p283_p5, %p282_p4 }
   0xd   :  { %p285_p7 = pnand %p284_p6, %p278_p3 }
   0xf   :  { %288 = shalt.err (!%p285_p7)
}
  0x10   :  { %s316_s22 = smov 128   ;;  %s317_s23 = smov 8  }
  0x11   :  { %23 = dma.hbm_to_vmem [thread:$0]  %s394_s1, 512, %s18_s13, [#allocation3], %s316_s22, %s316_s22, %s317_s23  }
  0x12   :  { %311 = dma.done.wait [#allocation3], 512  }
  0x13   :  { %312 = vsyncadd [#allocation3], 4294966784  ;;  %v318_v0 = vmov 0.0|0.0   ;;  %vm319_vm0 = vmmov 0   ;;  %v320_v1 = vmov 0.0   ;;  %v321_v2 = vmov 0  }
  0x14   :  { %243 = vmatprep.subr.bf16.mxu0 %v318_v0  ;;  %240 = vmatprep.mubr.msk.f32.mxu0 %vm319_vm0, %v320_v1  ;;  %v30_v3 = vld [vmem:[#allocation2] sm:$0xff]  ;;  %v31_v4 = vld [vmem:[#allocation2 + $0x8] sm:$0xff]  ;;  %vm119_vm1 = vcmask 211968   ;;  %v32_v5 = vld [vmem:[#allocation2 + $0x10] sm:$0xff]  ;;  %vm35_vm2 = vcmask 261120   ;;  %v137_v33 = vlaneseq  ;;  %vm190_vm6 = vcmask 7168  }
  0x15   :  { %257 = vset.pattern.permute.xlu0 %v321_v2  ;;  %258 = vset.pattern.permute.xlu1 %v321_v2  ;;  %v244_v6 = vpack.c.bf16 %v31_v4, %v30_v3  ;;  %v115_v7 = vmul.f32 %v30_v3, %v30_v3  ;;  %v116_v8 = vmul.f32 %v31_v4, %v31_v4  ;;  %v33_v9 = vld [vmem:[#allocation2 + $0x18] sm:$0xff]  ;;  %v29_v11 = vld [vmem:[%s393_s0] sm:$0xff] }
  0x16   :  { %v117_v10 = vmul.f32 %v32_v5, %v32_v5  ;;  %v118_v12 = vmul.f32 %v33_v9, %v33_v9  ;;  %v109_v13 = vmul.f32 %v29_v11, %v29_v11  ;;  %v247_v16 = vpack.c.bf16 %v33_v9, %v32_v5  ;;  %v34_v23 = vld [vmem:[%s395_s2] sm:$0xff]  ;;  %s322_s2 = smov [#allocation5]  }
  0x17   :  { %245 = vmatpush3.bf16.msra.mxu0 %v244_v6  ;;  %v120_v14 = vsel %vm119_vm1, %v115_v7, 0.0  ;;  %v121_v15 = vsel %vm119_vm1, %v116_v8, 0.0  ;;  %v366_v37 = vand.u32 127, %v137_v33  ;;  %s215_s28 = sshll.u32 %s322_s2, 4  ;;  %s216_s28 = int_to_ptr.vmem [resolvable:$true] %s215_s28 }
  0x18   :  { %v123_v17 = vsel %vm119_vm1, %v117_v10, 0.0  ;;  %v122_v18 = vadd.f32 %v121_v15, %v120_v14  ;;  %246 = vmatprep.subr.bf16.mxu0 %v318_v0  ;;  %v110_v19 = vsel %vm35_vm2, %v109_v13, 0.0  ;;  %v125_v20 = vsel %vm119_vm1, %v118_v12, 0.0  ;;  %s289_s29 = scalar_lea.vmem %s216_s28, 16  ;;  %s293_s30 = scalar_lea.vmem %s216_s28, 32 }
  0x19   :  { %111 = vadd.xlane.f32.xlu0 %v110_v19  ;;  %vm200_vm8 = vcmp.eq.s32.totalorder %v366_v37, 1  ;;  %vm199_vm9 = vcmp.eq.s32.totalorder %v366_v37, 0  ;;  %p290_p8 = scmp.ne.s32.totalorder %s216_s28, %s289_s29  ;;  %p294_p9 = scmp.lt.s32.totalorder %s216_s28, %s216_s28 }
  0x1a   :  { %v124_v21 = vadd.f32 %v123_v17, %v122_v18  ;;  %p295_p10 = scmp.lt.s32.totalorder %s293_s30, %s289_s29 }
  0x1b   :  { %248 = vmatpush3.bf16.msra.mxu0 %v247_v16 }
  0x1c   :  { %v126_v22 = vadd.f32 %v125_v20, %v124_v21  ;;  %p296_p11 = por %p295_p10, %p294_p9 }
  0x1e   :  { %241 = vmatmul.mubr.msk.f32.vlgmr.msra.gmra.mrb[0].mxu0 %vm35_vm2, %v29_v11  ;;  %v127_v24 = vrot.slane %v126_v22, 4  ;;  %p297_p12 = pnand %p296_p11, %p290_p8 }
  0x20   :  { %v128_v25 = vadd.f32 %v127_v24, %v126_v22 }
  0x22   :  { %v129_v26 = vrot.slane %v128_v25, 2 }
  0x24   :  { %v130_v27 = vadd.f32 %v129_v26, %v128_v25 }
  0x26   :  { %v131_v28 = vrot.slane %v130_v27, 1 }
  0x28   :  { %v132_v30 = vadd.f32 %v131_v28, %v130_v27 }
  0x2a   :  { %v133_v32 = vmax.f32 %v132_v30, 1e-24 }
  0x2f   :  { %140 = vperm.xlu0 %257, %v34_v23  }
  0xa6   :  { %v112_v29 = vpop.xlane.xlu0 %111 }
  0xa7   :  { %v113_v31 = vmax.f32 %v112_v29, 1e-24 }
  0xa9   :  { %259 = vrsqrt.f32 %v113_v31 }
  0xaa   :  { %261 = vrsqrt.f32 %v133_v32 }
  0xae   :  { %v141_v40 = vpop.permute.xlu0 %140 }
  0xaf   :  { %vm142_vm3 = vcmp.eq.s32.totalorder %v366_v37, %v141_v40 }
  0xb3   :  { %v260_v34 = vpop.eup %259 }
  0xb4   :  { %v262_v35 = vpop.eup %261 }
  0xf1   :  { %v105_v36 = vpop.f32.mrb[0].mxu0 }
  0xf2   :  { %v135_v38 = vmul.f32 %v260_v34, %v105_v36  ;;  %v242_v39 = vpop.f32.mrb[1].mxu0 }
  0xf4   :  { %v136_v41 = vmul.f32 %v262_v35, %v135_v38 }
  0xf6   :  { %v225_v42 = vadd.f32 -0.3, %v136_v41 }
  0xf8   :  { %v144_v43 = vsel %vm142_vm3, %v225_v42, %v136_v41 }
  0xf9   :  { %v145_v44 = vmul.f32 15.0, %v144_v43 }
  0xfb   :  { %v146_v45 = vsel %vm119_vm1, %v145_v44, -inf  ;;  %v158_v59 = vsel %vm142_vm3, %v145_v44, 0.0 }
  0xfc   :  { %147 = vmax.xlane.f32.xlu1 %v146_v45  ;;  %v159_v60 = vsel %vm119_vm1, %v158_v59, 0.0 }
 0x189   :  { %v148_v46 = vpop.xlane.xlu1 %147 }
 0x18a   :  { %vm170_vm4 = vcmp.eq.f32.partialorder %v145_v44, %v148_v46  ;;  %v149_v51 = vsub.f32 %v145_v44, %v148_v46 }
 0x18b   :  { %v171_v47 = vsel %vm170_vm4, %v366_v37, 26 }
 0x18c   :  { %v172_v48 = vsel %vm119_vm1, %v171_v47, 2147483647  ;;  %v150_v52 = vmul.f32 1.442695, %v149_v51 }
 0x18d   :  { %v174_v49 = vshra.s32 %v172_v48, 16  ;;  %v173_v53 = vand.u32 65535, %v172_v48 }
 0x18e   :  { %263 = vpow2.f32 %v150_v52 }
 0x18f   :  { %v176_v50 = vcvt.s32.f32 %v174_v49  ;;  %v175_v55 = vcvt.s32.f32 %v173_v53 }
 0x191   :  { %177 = vmin.xlane.f32.xlu1 %v176_v50 }
 0x198   :  { %v264_v57 = vpop.eup %263 }
 0x199   :  { %v152_v58 = vsel %vm119_vm1, %v264_v57, 0.0 }
 0x21e   :  { %v178_v54 = vpop.xlane.xlu1 %177 }
 0x21f   :  { %vm179_vm5 = vcmp.eq.f32.partialorder %v176_v50, %v178_v54  ;;  %v184_v61 = vcvt.f32.s32 %v178_v54 }
 0x220   :  { %v180_v56 = vsel %vm179_vm5, %v175_v55, inf }
 0x221   :  { %181 = vmin.xlane.f32.xlu1 %v180_v56  ;;  %v185_v63 = vshll.u32 %v184_v61, 16 }
 0x225   :  { %153 = vadd.xlane.f32.xlu1 %v152_v58 }
 0x229   :  { %160 = vadd.xlane.f32.xlu1 %v159_v60 }
 0x2ae   :  { %v182_v62 = vpop.xlane.xlu1 %181 }
 0x2af   :  { %v183_v0 = vcvt.f32.s32 %v182_v62 }
 0x2b1   :  { %v186_v2 = vadd.s32 %v185_v63, %v183_v0 }
 0x2b2   :  { %v154_v12 = vpop.xlane.xlu1 %153 }
 0x2b3   :  { %vm187_vm7 = vcmp.eq.s32.totalorder %v186_v2, %v34_v23  ;;  %265 = vlog2.f32 %v154_v12 }
 0x2b4   :  { %v226_v3 = vsel %vm187_vm7, 1.0, %v320_v1 }
 0x2b5   :  { %v191_v4 = vsel %vm190_vm6, %v226_v3, 0.0 }
 0x2b6   :  { %v192_v5 = vrot.slane %v191_v4, 4  ;;  %v161_v16 = vpop.xlane.xlu1 %160 }
 0x2b8   :  { %v193_v6 = vadd.f32 %v192_v5, %v191_v4 }
 0x2ba   :  { %v194_v7 = vrot.slane %v193_v6, 2 }
 0x2bc   :  { %v195_v8 = vadd.f32 %v194_v7, %v193_v6 }
 0x2bd   :  { %v266_v13 = vpop.eup %265 }
 0x2be   :  { %v196_v9 = vrot.slane %v195_v8, 1  ;;  %v156_v14 = vmul.f32 0.6931472, %v266_v13 }
 0x2c0   :  { %v197_v10 = vadd.f32 %v196_v9, %v195_v8  ;;  %v157_v15 = vadd.f32 %v156_v14, %v148_v46 }
 0x2c2   :  { %v198_v11 = vmul.f32 12.5, %v197_v10  ;;  %v162_v17 = vsub.f32 %v157_v15, %v161_v16 }
 0x2c4   :  { %203 = vperm.xlu1 %258, %v198_v11   ;;  %v163_v18 = vrot.slane %v162_v17, 4 }
 0x2c6   :  { %v164_v19 = vadd.f32 %v163_v18, %v162_v17 }
 0x2c8   :  { %v165_v20 = vrot.slane %v164_v19, 2 }
 0x2ca   :  { %v166_v1 = vadd.f32 %v165_v20, %v164_v19 }
 0x2cc   :  { %v167_v21 = vrot.slane %v166_v1, 1 }
 0x2ce   :  { %v168_v22 = vadd.f32 %v167_v21, %v166_v1 }
 0x2d0   :  { %v169_v23 = vmul.f32 0.125, %v168_v22 }
 0x343   :  { %v204_v24 = vpop.permute.xlu1 %203 }
 0x344   :  { %v206_v25 = vsel %vm200_vm8, %v204_v24, 0.0 }
 0x345   :  { %v207_v26 = vsel %vm199_vm9, %v169_v23, %v206_v25 }
 0x346   :  { %208 = vst [vmem:[#allocation5] sm:$0x1] %v207_v26 }
 0x347   :  { %300 = shalt.err (!%p297_p12)
}
 0x348   :  { %s301_s6 = scalar_lea.hbm %s396_s3, 16 }
 0x349   :  { %p302_p13 = scmp.ne.s32.totalorder %s396_s3, %s301_s6  ;;  %p305_p0 = scmp.lt.u32.totalorder %s301_s6, %s396_s3 }
 0x34b   :  { %p307_p1 = pnand %p305_p0, %p302_p13 }
 0x34d   :  { %310 = shalt.err (!%p307_p1)
}
 0x34e   :  { %218 = dma.vmem_to_hbm [thread:$0]  %s216_s28, 16, %s396_s3, [#allocation4]  }
 0x34f   :  { %313 = dma.done.wait [#allocation4], 16  }
 0x350   :  { %314 = vsyncadd [#allocation4], 4294967280 }
 0x351   :  { %222 = vsyncpa [#allocation3], 1 }
 0x352   :  { %223 = vsyncpa [#allocation4], 1 }

</bundles_post_ra>
